<compile_context>
chip_gen: v6e
topology: v6e:2x2x1
jax: 0.10.0
libtpu: 0.0.40
codegen_flags: <defaults>
</compile_context>

<pallas_src>
import functools

import jax
import jax.numpy as jnp
from jax.experimental import pallas as pl
from jax.experimental.pallas import tpu as pltpu

_LANE = 128


def _dwconv_kernel(x_ref, w_ref, b_ref, o_ref, *, kh, kw, h_out, w_out,
                   stride, dilation, row_chunk=8):
    """One batch element of a depthwise conv, channels-last.

    x_ref: (1, H_pad, W_pad, C_pad)   padded input plane (VMEM)
    w_ref: (KH*KW, C_pad)             per-tap per-channel filter (VMEM, resident)
    b_ref: (1, C_pad)                 per-channel bias (VMEM, resident)
    o_ref: (1, H_out, W_out, C_pad)   output plane (VMEM)
    """
    c_pad = o_ref.shape[-1]
    wd = (w_out - 1) * stride + 1                     # dense width span

    # Filter taps / bias: loaded once per grid step, tiny (<= 10 vregs).
    w_taps = w_ref[...].astype(jnp.float32)           # (KH*KW, C_pad)
    bias = b_ref[0, :].astype(jnp.float32)            # (C_pad,)

    # Row-chunked accumulation keeps live f32 vregs modest (v5e-friendly)
    # while every tap stays a whole-vreg VPU MAC (C is the lane axis).
    for h0 in range(0, h_out, row_chunk):
        ch = min(row_chunk, h_out - h0)
        hd = (ch - 1) * stride + 1                    # dense row span
        acc = jnp.zeros((hd, wd, c_pad), jnp.float32)
        for i in range(kh):
            for j in range(kw):
                r0 = i * dilation + h0 * stride
                c0 = j * dilation
                patch = x_ref[0, r0:r0 + hd, c0:c0 + wd, :].astype(jnp.float32)
                acc = acc + patch * w_taps[i * kw + j]
        if stride > 1:
            # Single downsample per chunk instead of strided slices per tap.
            acc = acc[::stride, ::stride, :]
        acc = acc + bias
        o_ref[0, h0:h0 + ch, :, :] = acc.astype(o_ref.dtype)


@functools.partial(jax.jit, static_argnames=("stride", "padding", "dilation"))
def depthwise_conv2d(x, weight, bias, *, stride=1, padding=0, dilation=1):
    """Depthwise conv2d (groups == in_channels == out_channels).

    x:      (N, C, H, W)     NCHW, like PyTorch
    weight: (C, 1, KH, KW)   PyTorch depthwise layout
    bias:   (C,)
    returns (N, C, H_out, W_out)
    """
    n, c, h, w = x.shape
    c_w, one, kh, kw = weight.shape
    assert c_w == c and one == 1, "depthwise layout: weight must be (C,1,KH,KW)"
    # TODO(synk): arbitrary `groups` (1 < groups < C) not implemented; this
    # kernel covers the depthwise case the module is named for.

    h_out = (h + 2 * padding - dilation * (kh - 1) - 1) // stride + 1
    w_out = (w + 2 * padding - dilation * (kw - 1) - 1) // stride + 1

    # Lane-dense layout: C padded up to a multiple of 128 lanes. For the real
    # Hourglass channel counts (64/128/256) this is zero or minimal padding.
    c_pad = ((c + _LANE - 1) // _LANE) * _LANE

    # NCHW -> NHWC + spatial zero pad + channel pad. XLA fuses this into one
    # copy of the input (kept in the input dtype; no pre-cast to f32).
    xt = jnp.transpose(x, (0, 2, 3, 1))
    xt = jnp.pad(xt, ((0, 0), (padding, padding), (padding, padding),
                      (0, c_pad - c)))
    hp, wp = h + 2 * padding, w + 2 * padding

    # Filter as (KH*KW, C_pad): one per-lane weight vector per tap.
    w_taps = jnp.pad(weight.reshape(c, kh * kw).T, ((0, 0), (0, c_pad - c)))
    # Bias as a (1, C_pad) lane vector (resident in VMEM, broadcast per row).
    b_row = jnp.pad(bias, (0, c_pad - c)).reshape(1, c_pad)

    kernel = functools.partial(
        _dwconv_kernel, kh=kh, kw=kw, h_out=h_out, w_out=w_out,
        stride=stride, dilation=dilation)

    out_nhwc = pl.pallas_call(
        kernel,
        out_shape=jax.ShapeDtypeStruct((n, h_out, w_out, c_pad), x.dtype),
        grid_spec=pltpu.PrefetchScalarGridSpec(
            num_scalar_prefetch=0,
            grid=(n,),                                # coarse; parallel for v7x
            in_specs=[
                # one padded NHWC plane per grid step
                pl.BlockSpec((1, hp, wp, c_pad), lambda ni: (ni, 0, 0, 0)),
                # full filter, constant index_map -> DMA'd once, stays resident
                pl.BlockSpec((kh * kw, c_pad), lambda ni: (0, 0)),
                # full bias, constant index_map -> resident
                pl.BlockSpec((1, c_pad), lambda ni: (0, 0)),
            ],
            out_specs=pl.BlockSpec((1, h_out, w_out, c_pad),
                                   lambda ni: (ni, 0, 0, 0)),
        ),
        compiler_params=pltpu.CompilerParams(
            dimension_semantics=("parallel",)),
    )(xt, w_taps, b_row)

    # Drop channel padding, back to NCHW (PyTorch semantics).
    return jnp.transpose(out_nhwc[..., :c], (0, 3, 1, 2))


def _reference(x, weight, bias, *, stride, padding, dilation):
    c = x.shape[1]
    out = jax.lax.conv_general_dilated(
        x, weight,
        window_strides=(stride, stride),
        padding=[(padding, padding), (padding, padding)],
        rhs_dilation=(dilation, dilation),
        dimension_numbers=("NCHW", "OIHW", "NCHW"),
        feature_group_count=c)
    return out + bias.reshape(1, c, 1, 1)


if __name__ == "__main__":
    # DepthwiseConv2D(in_channels=4, out_channels=4, kernel_size=3,
    #                 stride=1, padding=1, groups=4, bias=True)
    N, C, H, W = 2, 4, 16, 16
    KH = KW = 3
    STRIDE, PADDING, DILATION = 1, 1, 1

    key = jax.random.PRNGKey(0)
    kx, kw_, kb = jax.random.split(key, 3)
    x = jax.random.normal(kx, (N, C, H, W), dtype=jnp.float32)
    # Deterministic parameter init (synthetic, no checkpoint load).
    weight = jax.random.normal(kw_, (C, 1, KH, KW), dtype=jnp.float32) * 0.1
    bias = jax.random.normal(kb, (C,), dtype=jnp.float32) * 0.1

    out = depthwise_conv2d(x, weight, bias,
                           stride=STRIDE, padding=PADDING, dilation=DILATION)
    out = jax.block_until_ready(out)

    ref = _reference(x, weight, bias,
                     stride=STRIDE, padding=PADDING, dilation=DILATION)
    assert out.shape == ref.shape == (N, C, H, W)
    assert jnp.allclose(out, ref, atol=1e-5, rtol=1e-5)

    print("KERNEL_OK")
</pallas_src>

<mosaic_0001>
module attributes {stable_mosaic.version = 11 : i64} {
  func.func @_dwconv_kernel(%arg0: i32, %arg1: memref<1x18x18x128xf32, #tpu.memory_space<vmem>>, %arg2: memref<9x128xf32, #tpu.memory_space<vmem>>, %arg3: memref<1x128xf32, #tpu.memory_space<vmem>>, %arg4: memref<1x16x16x128xf32, #tpu.memory_space<vmem>>) attributes {dimension_semantics = [#tpu.dimension_semantics<parallel>], iteration_bounds = array<i64: 2>, scalar_prefetch = 0 : i64, scratch_operands = 0 : i64, tpu.core_type = #tpu.core_type<tc>, window_params = [{transform_indices = @transform_0, window_bounds = array<i64: 1, 18, 18, 128>}, {pipeline_mode = #tpu.pipeline_mode<synchronous>, transform_indices = @transform_1, window_bounds = array<i64: 9, 128>}, {pipeline_mode = #tpu.pipeline_mode<synchronous>, transform_indices = @transform_2, window_bounds = array<i64: 1, 128>}, {transform_indices = @transform_3, window_bounds = array<i64: 1, 16, 16, 128>}]} {
    %c0 = arith.constant 0 : index
    %c0_0 = arith.constant 0 : index
    %0 = vector.load %arg2[%c0, %c0_0] : memref<9x128xf32, #tpu.memory_space<vmem>>, vector<9x128xf32>
    %c0_1 = arith.constant 0 : index
    %c0_2 = arith.constant 0 : index
    %1 = vector.load %arg3[%c0_1, %c0_2] : memref<1x128xf32, #tpu.memory_space<vmem>>, vector<1x128xf32>
    %2 = vector.shape_cast %1 : vector<1x128xf32> to vector<128xf32>
    %cst = arith.constant 0.000000e+00 : f32
    %3 = vector.broadcast %cst : f32 to vector<8x16x128xf32>
    %c0_3 = arith.constant 0 : index
    %c0_4 = arith.constant 0 : index
    %c0_5 = arith.constant 0 : index
    %c0_6 = arith.constant 0 : index
    %4 = vector.load %arg1[%c0_3, %c0_4, %c0_5, %c0_6] : memref<1x18x18x128xf32, #tpu.memory_space<vmem>>, vector<1x8x16x128xf32>
    %5 = vector.shape_cast %4 : vector<1x8x16x128xf32> to vector<8x16x128xf32>
    %6 = vector.extract_strided_slice %0 {offsets = [0, 0], sizes = [1, 128], strides = [1, 1]} : vector<9x128xf32> to vector<1x128xf32>
    %7 = vector.shape_cast %6 : vector<1x128xf32> to vector<128xf32>
    %8 = vector.shape_cast %7 : vector<128xf32> to vector<1x1x128xf32>
    %9 = vector.broadcast %8 : vector<1x1x128xf32> to vector<8x16x128xf32>
    %10 = arith.mulf %5, %9 : vector<8x16x128xf32>
    %11 = arith.addf %3, %10 : vector<8x16x128xf32>
    %c0_7 = arith.constant 0 : index
    %c0_8 = arith.constant 0 : index
    %c1 = arith.constant 1 : index
    %c0_9 = arith.constant 0 : index
    %12 = vector.load %arg1[%c0_7, %c0_8, %c1, %c0_9] : memref<1x18x18x128xf32, #tpu.memory_space<vmem>>, vector<1x8x16x128xf32>
    %13 = vector.shape_cast %12 : vector<1x8x16x128xf32> to vector<8x16x128xf32>
    %14 = vector.extract_strided_slice %0 {offsets = [1, 0], sizes = [1, 128], strides = [1, 1]} : vector<9x128xf32> to vector<1x128xf32>
    %15 = vector.shape_cast %14 : vector<1x128xf32> to vector<128xf32>
    %16 = vector.shape_cast %15 : vector<128xf32> to vector<1x1x128xf32>
    %17 = vector.broadcast %16 : vector<1x1x128xf32> to vector<8x16x128xf32>
    %18 = arith.mulf %13, %17 : vector<8x16x128xf32>
    %19 = arith.addf %11, %18 : vector<8x16x128xf32>
    %c0_10 = arith.constant 0 : index
    %c0_11 = arith.constant 0 : index
    %c2 = arith.constant 2 : index
    %c0_12 = arith.constant 0 : index
    %20 = vector.load %arg1[%c0_10, %c0_11, %c2, %c0_12] : memref<1x18x18x128xf32, #tpu.memory_space<vmem>>, vector<1x8x16x128xf32>
    %21 = vector.shape_cast %20 : vector<1x8x16x128xf32> to vector<8x16x128xf32>
    %22 = vector.extract_strided_slice %0 {offsets = [2, 0], sizes = [1, 128], strides = [1, 1]} : vector<9x128xf32> to vector<1x128xf32>
    %23 = vector.shape_cast %22 : vector<1x128xf32> to vector<128xf32>
    %24 = vector.shape_cast %23 : vector<128xf32> to vector<1x1x128xf32>
    %25 = vector.broadcast %24 : vector<1x1x128xf32> to vector<8x16x128xf32>
    %26 = arith.mulf %21, %25 : vector<8x16x128xf32>
    %27 = arith.addf %19, %26 : vector<8x16x128xf32>
    %c0_13 = arith.constant 0 : index
    %c1_14 = arith.constant 1 : index
    %c0_15 = arith.constant 0 : index
    %c0_16 = arith.constant 0 : index
    %28 = vector.load %arg1[%c0_13, %c1_14, %c0_15, %c0_16] : memref<1x18x18x128xf32, #tpu.memory_space<vmem>>, vector<1x8x16x128xf32>
    %29 = vector.shape_cast %28 : vector<1x8x16x128xf32> to vector<8x16x128xf32>
    %30 = vector.extract_strided_slice %0 {offsets = [3, 0], sizes = [1, 128], strides = [1, 1]} : vector<9x128xf32> to vector<1x128xf32>
    %31 = vector.shape_cast %30 : vector<1x128xf32> to vector<128xf32>
    %32 = vector.shape_cast %31 : vector<128xf32> to vector<1x1x128xf32>
    %33 = vector.broadcast %32 : vector<1x1x128xf32> to vector<8x16x128xf32>
    %34 = arith.mulf %29, %33 : vector<8x16x128xf32>
    %35 = arith.addf %27, %34 : vector<8x16x128xf32>
    %c0_17 = arith.constant 0 : index
    %c1_18 = arith.constant 1 : index
    %c1_19 = arith.constant 1 : index
    %c0_20 = arith.constant 0 : index
    %36 = vector.load %arg1[%c0_17, %c1_18, %c1_19, %c0_20] : memref<1x18x18x128xf32, #tpu.memory_space<vmem>>, vector<1x8x16x128xf32>
    %37 = vector.shape_cast %36 : vector<1x8x16x128xf32> to vector<8x16x128xf32>
    %38 = vector.extract_strided_slice %0 {offsets = [4, 0], sizes = [1, 128], strides = [1, 1]} : vector<9x128xf32> to vector<1x128xf32>
    %39 = vector.shape_cast %38 : vector<1x128xf32> to vector<128xf32>
    %40 = vector.shape_cast %39 : vector<128xf32> to vector<1x1x128xf32>
    %41 = vector.broadcast %40 : vector<1x1x128xf32> to vector<8x16x128xf32>
    %42 = arith.mulf %37, %41 : vector<8x16x128xf32>
    %43 = arith.addf %35, %42 : vector<8x16x128xf32>
    %c0_21 = arith.constant 0 : index
    %c1_22 = arith.constant 1 : index
    %c2_23 = arith.constant 2 : index
    %c0_24 = arith.constant 0 : index
    %44 = vector.load %arg1[%c0_21, %c1_22, %c2_23, %c0_24] : memref<1x18x18x128xf32, #tpu.memory_space<vmem>>, vector<1x8x16x128xf32>
    %45 = vector.shape_cast %44 : vector<1x8x16x128xf32> to vector<8x16x128xf32>
    %46 = vector.extract_strided_slice %0 {offsets = [5, 0], sizes = [1, 128], strides = [1, 1]} : vector<9x128xf32> to vector<1x128xf32>
    %47 = vector.shape_cast %46 : vector<1x128xf32> to vector<128xf32>
    %48 = vector.shape_cast %47 : vector<128xf32> to vector<1x1x128xf32>
    %49 = vector.broadcast %48 : vector<1x1x128xf32> to vector<8x16x128xf32>
    %50 = arith.mulf %45, %49 : vector<8x16x128xf32>
    %51 = arith.addf %43, %50 : vector<8x16x128xf32>
    %c0_25 = arith.constant 0 : index
    %c2_26 = arith.constant 2 : index
    %c0_27 = arith.constant 0 : index
    %c0_28 = arith.constant 0 : index
    %52 = vector.load %arg1[%c0_25, %c2_26, %c0_27, %c0_28] : memref<1x18x18x128xf32, #tpu.memory_space<vmem>>, vector<1x8x16x128xf32>
    %53 = vector.shape_cast %52 : vector<1x8x16x128xf32> to vector<8x16x128xf32>
    %54 = vector.extract_strided_slice %0 {offsets = [6, 0], sizes = [1, 128], strides = [1, 1]} : vector<9x128xf32> to vector<1x128xf32>
    %55 = vector.shape_cast %54 : vector<1x128xf32> to vector<128xf32>
    %56 = vector.shape_cast %55 : vector<128xf32> to vector<1x1x128xf32>
    %57 = vector.broadcast %56 : vector<1x1x128xf32> to vector<8x16x128xf32>
    %58 = arith.mulf %53, %57 : vector<8x16x128xf32>
    %59 = arith.addf %51, %58 : vector<8x16x128xf32>
    %c0_29 = arith.constant 0 : index
    %c2_30 = arith.constant 2 : index
    %c1_31 = arith.constant 1 : index
    %c0_32 = arith.constant 0 : index
    %60 = vector.load %arg1[%c0_29, %c2_30, %c1_31, %c0_32] : memref<1x18x18x128xf32, #tpu.memory_space<vmem>>, vector<1x8x16x128xf32>
    %61 = vector.shape_cast %60 : vector<1x8x16x128xf32> to vector<8x16x128xf32>
    %62 = vector.extract_strided_slice %0 {offsets = [7, 0], sizes = [1, 128], strides = [1, 1]} : vector<9x128xf32> to vector<1x128xf32>
    %63 = vector.shape_cast %62 : vector<1x128xf32> to vector<128xf32>
    %64 = vector.shape_cast %63 : vector<128xf32> to vector<1x1x128xf32>
    %65 = vector.broadcast %64 : vector<1x1x128xf32> to vector<8x16x128xf32>
    %66 = arith.mulf %61, %65 : vector<8x16x128xf32>
    %67 = arith.addf %59, %66 : vector<8x16x128xf32>
    %c0_33 = arith.constant 0 : index
    %c2_34 = arith.constant 2 : index
    %c2_35 = arith.constant 2 : index
    %c0_36 = arith.constant 0 : index
    %68 = vector.load %arg1[%c0_33, %c2_34, %c2_35, %c0_36] : memref<1x18x18x128xf32, #tpu.memory_space<vmem>>, vector<1x8x16x128xf32>
    %69 = vector.shape_cast %68 : vector<1x8x16x128xf32> to vector<8x16x128xf32>
    %70 = vector.extract_strided_slice %0 {offsets = [8, 0], sizes = [1, 128], strides = [1, 1]} : vector<9x128xf32> to vector<1x128xf32>
    %71 = vector.shape_cast %70 : vector<1x128xf32> to vector<128xf32>
    %72 = vector.shape_cast %71 : vector<128xf32> to vector<1x1x128xf32>
    %73 = vector.broadcast %72 : vector<1x1x128xf32> to vector<8x16x128xf32>
    %74 = arith.mulf %69, %73 : vector<8x16x128xf32>
    %75 = arith.addf %67, %74 : vector<8x16x128xf32>
    %76 = vector.shape_cast %2 : vector<128xf32> to vector<1x1x128xf32>
    %77 = vector.broadcast %76 : vector<1x1x128xf32> to vector<8x16x128xf32>
    %78 = arith.addf %75, %77 : vector<8x16x128xf32>
    %c0_37 = arith.constant 0 : index
    %c0_38 = arith.constant 0 : index
    %c0_39 = arith.constant 0 : index
    %c0_40 = arith.constant 0 : index
    %79 = vector.load %arg4[%c0_37, %c0_38, %c0_39, %c0_40] : memref<1x16x16x128xf32, #tpu.memory_space<vmem>>, vector<1x8x16x128xf32>
    %80 = vector.shape_cast %79 : vector<1x8x16x128xf32> to vector<8x16x128xf32>
    %81 = vector.shape_cast %78 : vector<8x16x128xf32> to vector<1x8x16x128xf32>
    tpu.vector_store %arg4[%c0_37, %c0_38, %c0_39, %c0_40], %81 {strides = array<i32>} : memref<1x16x16x128xf32, #tpu.memory_space<vmem>>, vector<1x8x16x128xf32>,
    %cst_41 = arith.constant 0.000000e+00 : f32
    %82 = vector.broadcast %cst_41 : f32 to vector<8x16x128xf32>
    %c0_42 = arith.constant 0 : index
    %c8 = arith.constant 8 : index
    %c0_43 = arith.constant 0 : index
    %c0_44 = arith.constant 0 : index
    %83 = vector.load %arg1[%c0_42, %c8, %c0_43, %c0_44] : memref<1x18x18x128xf32, #tpu.memory_space<vmem>>, vector<1x8x16x128xf32>
    %84 = vector.shape_cast %83 : vector<1x8x16x128xf32> to vector<8x16x128xf32>
    %85 = vector.extract_strided_slice %0 {offsets = [0, 0], sizes = [1, 128], strides = [1, 1]} : vector<9x128xf32> to vector<1x128xf32>
    %86 = vector.shape_cast %85 : vector<1x128xf32> to vector<128xf32>
    %87 = vector.shape_cast %86 : vector<128xf32> to vector<1x1x128xf32>
    %88 = vector.broadcast %87 : vector<1x1x128xf32> to vector<8x16x128xf32>
    %89 = arith.mulf %84, %88 : vector<8x16x128xf32>
    %90 = arith.addf %82, %89 : vector<8x16x128xf32>
    %c0_45 = arith.constant 0 : index
    %c8_46 = arith.constant 8 : index
    %c1_47 = arith.constant 1 : index
    %c0_48 = arith.constant 0 : index
    %91 = vector.load %arg1[%c0_45, %c8_46, %c1_47, %c0_48] : memref<1x18x18x128xf32, #tpu.memory_space<vmem>>, vector<1x8x16x128xf32>
    %92 = vector.shape_cast %91 : vector<1x8x16x128xf32> to vector<8x16x128xf32>
    %93 = vector.extract_strided_slice %0 {offsets = [1, 0], sizes = [1, 128], strides = [1, 1]} : vector<9x128xf32> to vector<1x128xf32>
    %94 = vector.shape_cast %93 : vector<1x128xf32> to vector<128xf32>
    %95 = vector.shape_cast %94 : vector<128xf32> to vector<1x1x128xf32>
    %96 = vector.broadcast %95 : vector<1x1x128xf32> to vector<8x16x128xf32>
    %97 = arith.mulf %92, %96 : vector<8x16x128xf32>
    %98 = arith.addf %90, %97 : vector<8x16x128xf32>
    %c0_49 = arith.constant 0 : index
    %c8_50 = arith.constant 8 : index
    %c2_51 = arith.constant 2 : index
    %c0_52 = arith.constant 0 : index
    %99 = vector.load %arg1[%c0_49, %c8_50, %c2_51, %c0_52] : memref<1x18x18x128xf32, #tpu.memory_space<vmem>>, vector<1x8x16x128xf32>
    %100 = vector.shape_cast %99 : vector<1x8x16x128xf32> to vector<8x16x128xf32>
    %101 = vector.extract_strided_slice %0 {offsets = [2, 0], sizes = [1, 128], strides = [1, 1]} : vector<9x128xf32> to vector<1x128xf32>
    %102 = vector.shape_cast %101 : vector<1x128xf32> to vector<128xf32>
    %103 = vector.shape_cast %102 : vector<128xf32> to vector<1x1x128xf32>
    %104 = vector.broadcast %103 : vector<1x1x128xf32> to vector<8x16x128xf32>
    %105 = arith.mulf %100, %104 : vector<8x16x128xf32>
    %106 = arith.addf %98, %105 : vector<8x16x128xf32>
    %c0_53 = arith.constant 0 : index
    %c9 = arith.constant 9 : index
    %c0_54 = arith.constant 0 : index
    %c0_55 = arith.constant 0 : index
    %107 = vector.load %arg1[%c0_53, %c9, %c0_54, %c0_55] : memref<1x18x18x128xf32, #tpu.memory_space<vmem>>, vector<1x8x16x128xf32>
    %108 = vector.shape_cast %107 : vector<1x8x16x128xf32> to vector<8x16x128xf32>
    %109 = vector.extract_strided_slice %0 {offsets = [3, 0], sizes = [1, 128], strides = [1, 1]} : vector<9x128xf32> to vector<1x128xf32>
    %110 = vector.shape_cast %109 : vector<1x128xf32> to vector<128xf32>
    %111 = vector.shape_cast %110 : vector<128xf32> to vector<1x1x128xf32>
    %112 = vector.broadcast %111 : vector<1x1x128xf32> to vector<8x16x128xf32>
    %113 = arith.mulf %108, %112 : vector<8x16x128xf32>
    %114 = arith.addf %106, %113 : vector<8x16x128xf32>
    %c0_56 = arith.constant 0 : index
    %c9_57 = arith.constant 9 : index
    %c1_58 = arith.constant 1 : index
    %c0_59 = arith.constant 0 : index
    %115 = vector.load %arg1[%c0_56, %c9_57, %c1_58, %c0_59] : memref<1x18x18x128xf32, #tpu.memory_space<vmem>>, vector<1x8x16x128xf32>
    %116 = vector.shape_cast %115 : vector<1x8x16x128xf32> to vector<8x16x128xf32>
    %117 = vector.extract_strided_slice %0 {offsets = [4, 0], sizes = [1, 128], strides = [1, 1]} : vector<9x128xf32> to vector<1x128xf32>
    %118 = vector.shape_cast %117 : vector<1x128xf32> to vector<128xf32>
    %119 = vector.shape_cast %118 : vector<128xf32> to vector<1x1x128xf32>
    %120 = vector.broadcast %119 : vector<1x1x128xf32> to vector<8x16x128xf32>
    %121 = arith.mulf %116, %120 : vector<8x16x128xf32>
    %122 = arith.addf %114, %121 : vector<8x16x128xf32>
    %c0_60 = arith.constant 0 : index
    %c9_61 = arith.constant 9 : index
    %c2_62 = arith.constant 2 : index
    %c0_63 = arith.constant 0 : index
    %123 = vector.load %arg1[%c0_60, %c9_61, %c2_62, %c0_63] : memref<1x18x18x128xf32, #tpu.memory_space<vmem>>, vector<1x8x16x128xf32>
    %124 = vector.shape_cast %123 : vector<1x8x16x128xf32> to vector<8x16x128xf32>
    %125 = vector.extract_strided_slice %0 {offsets = [5, 0], sizes = [1, 128], strides = [1, 1]} : vector<9x128xf32> to vector<1x128xf32>
    %126 = vector.shape_cast %125 : vector<1x128xf32> to vector<128xf32>
    %127 = vector.shape_cast %126 : vector<128xf32> to vector<1x1x128xf32>
    %128 = vector.broadcast %127 : vector<1x1x128xf32> to vector<8x16x128xf32>
    %129 = arith.mulf %124, %128 : vector<8x16x128xf32>
    %130 = arith.addf %122, %129 : vector<8x16x128xf32>
    %c0_64 = arith.constant 0 : index
    %c10 = arith.constant 10 : index
    %c0_65 = arith.constant 0 : index
    %c0_66 = arith.constant 0 : index
    %131 = vector.load %arg1[%c0_64, %c10, %c0_65, %c0_66] : memref<1x18x18x128xf32, #tpu.memory_space<vmem>>, vector<1x8x16x128xf32>
    %132 = vector.shape_cast %131 : vector<1x8x16x128xf32> to vector<8x16x128xf32>
    %133 = vector.extract_strided_slice %0 {offsets = [6, 0], sizes = [1, 128], strides = [1, 1]} : vector<9x128xf32> to vector<1x128xf32>
    %134 = vector.shape_cast %133 : vector<1x128xf32> to vector<128xf32>
    %135 = vector.shape_cast %134 : vector<128xf32> to vector<1x1x128xf32>
    %136 = vector.broadcast %135 : vector<1x1x128xf32> to vector<8x16x128xf32>
    %137 = arith.mulf %132, %136 : vector<8x16x128xf32>
    %138 = arith.addf %130, %137 : vector<8x16x128xf32>
    %c0_67 = arith.constant 0 : index
    %c10_68 = arith.constant 10 : index
    %c1_69 = arith.constant 1 : index
    %c0_70 = arith.constant 0 : index
    %139 = vector.load %arg1[%c0_67, %c10_68, %c1_69, %c0_70] : memref<1x18x18x128xf32, #tpu.memory_space<vmem>>, vector<1x8x16x128xf32>
    %140 = vector.shape_cast %139 : vector<1x8x16x128xf32> to vector<8x16x128xf32>
    %141 = vector.extract_strided_slice %0 {offsets = [7, 0], sizes = [1, 128], strides = [1, 1]} : vector<9x128xf32> to vector<1x128xf32>
    %142 = vector.shape_cast %141 : vector<1x128xf32> to vector<128xf32>
    %143 = vector.shape_cast %142 : vector<128xf32> to vector<1x1x128xf32>
    %144 = vector.broadcast %143 : vector<1x1x128xf32> to vector<8x16x128xf32>
    %145 = arith.mulf %140, %144 : vector<8x16x128xf32>
    %146 = arith.addf %138, %145 : vector<8x16x128xf32>
    %c0_71 = arith.constant 0 : index
    %c10_72 = arith.constant 10 : index
    %c2_73 = arith.constant 2 : index
    %c0_74 = arith.constant 0 : index
    %147 = vector.load %arg1[%c0_71, %c10_72, %c2_73, %c0_74] : memref<1x18x18x128xf32, #tpu.memory_space<vmem>>, vector<1x8x16x128xf32>
    %148 = vector.shape_cast %147 : vector<1x8x16x128xf32> to vector<8x16x128xf32>
    %149 = vector.extract_strided_slice %0 {offsets = [8, 0], sizes = [1, 128], strides = [1, 1]} : vector<9x128xf32> to vector<1x128xf32>
    %150 = vector.shape_cast %149 : vector<1x128xf32> to vector<128xf32>
    %151 = vector.shape_cast %150 : vector<128xf32> to vector<1x1x128xf32>
    %152 = vector.broadcast %151 : vector<1x1x128xf32> to vector<8x16x128xf32>
    %153 = arith.mulf %148, %152 : vector<8x16x128xf32>
    %154 = arith.addf %146, %153 : vector<8x16x128xf32>
    %155 = vector.shape_cast %2 : vector<128xf32> to vector<1x1x128xf32>
    %156 = vector.broadcast %155 : vector<1x1x128xf32> to vector<8x16x128xf32>
    %157 = arith.addf %154, %156 : vector<8x16x128xf32>
    %c0_75 = arith.constant 0 : index
    %c8_76 = arith.constant 8 : index
    %c0_77 = arith.constant 0 : index
    %c0_78 = arith.constant 0 : index
    %158 = vector.load %arg4[%c0_75, %c8_76, %c0_77, %c0_78] : memref<1x16x16x128xf32, #tpu.memory_space<vmem>>, vector<1x8x16x128xf32>
    %159 = vector.shape_cast %158 : vector<1x8x16x128xf32> to vector<8x16x128xf32>
    %160 = vector.shape_cast %157 : vector<8x16x128xf32> to vector<1x8x16x128xf32>
    tpu.vector_store %arg4[%c0_75, %c8_76, %c0_77, %c0_78], %160 {strides = array<i32>} : memref<1x16x16x128xf32, #tpu.memory_space<vmem>>, vector<1x8x16x128xf32>,
    return
  }
  func.func @transform_0(%arg0: i32) -> (i32, i32, i32, i32) {
    %c0_i32 = arith.constant 0 : i32
    %c0_i32_0 = arith.constant 0 : i32
    %c0_i32_1 = arith.constant 0 : i32
    %c0_i32_2 = arith.constant 0 : i32
    return %arg0, %c0_i32, %c0_i32_0, %c0_i32_1 : i32, i32, i32, i32
  }
  func.func @transform_1(%arg0: i32) -> (i32, i32) {
    %c0_i32 = arith.constant 0 : i32
    %c0_i32_0 = arith.constant 0 : i32
    %c0_i32_1 = arith.constant 0 : i32
    return %c0_i32, %c0_i32_0 : i32, i32
  }
  func.func @transform_2(%arg0: i32) -> (i32, i32) {
    %c0_i32 = arith.constant 0 : i32
    %c0_i32_0 = arith.constant 0 : i32
    %c0_i32_1 = arith.constant 0 : i32
    return %c0_i32, %c0_i32_0 : i32, i32
  }
  func.func @transform_3(%arg0: i32) -> (i32, i32, i32, i32) {
    %c0_i32 = arith.constant 0 : i32
    %c0_i32_0 = arith.constant 0 : i32
    %c0_i32_1 = arith.constant 0 : i32
    %c0_i32_2 = arith.constant 0 : i32
    return %arg0, %c0_i32, %c0_i32_0, %c0_i32_1 : i32, i32, i32, i32
  }
}

</mosaic_0001>

<bundles_post_ra>
// kernel: depthwise_conv2d.1
= control target key start
LH: loop header
LB: loop body
LE: loop exit
PB: predicated region body
PF: predicated region fallthrough
CT: control target
= control target key end

     0   :  { %s1513_s12 = smov 0   ;;  %s2067_s0 = inlined_call_operand.vmem [shape: f32[2,18,18,128], index: 0, kind: input, shape index: {}]   ;;  %s2068_s1 = inlined_call_operand.vmem [shape: f32[9,128], index: 1, kind: input, shape index: {}]   ;;  %s2069_s2 = inlined_call_operand.vmem [shape: f32[1,128], index: 2, kind: input, shape index: {}]   ;;  %s2070_s3 = inlined_call_operand.vmem [shape: f32[2,16,16,128], index: 3, kind: output, shape index: {}]  }
   0x1 LB: > { %s1205_s13 = sadd.s32 4294967295, %s1491_s12   ;;  %p1209_p0 = scmp.ge.s32.totalorder %s1491_s12, 1  ;;  %s1491_s12 = sphi %s1513_s12, %s13_s12  }
   0x2   : > { %p137_p1 = scmp.lt.s32.totalorder %s1491_s12, 3 }
   0x4   : > { %p138_p2 = pnand %p1209_p0, %p137_p1 }
   0x5   : > { %p161_p3 = scmp.lt.s32.totalorder (!%p138_p2), %s1205_s13, 1 }
   0x6   : > { %141 = sbr.rel (%p138_p2) target bundleno = 174 (0xae), region = 32 }
   0xb   : > { %v190_v0 = vlaneseq  ;;  %s2072_s13 = smov (!%p161_p3, %s1205_s13), 1  ;;  %v171_v2 = vld [vmem:[%s2068_s1] sm:$0xff]  ;;  %v1559_v27 = vld [vmem:[%s2068_s1 + $0x8] ss:$0 sm:$0xff] }
   0xc   : > { %s1474_s16 = smul.u32 432, %s2072_s13  ;;  %s1473_s22 = sshll.u32 %s2072_s13, 8 }
   0xd   : > { %v191_v1 = vshrl.u32 %v190_v0, 7  ;;  %s1647_s27 = scalar_lea.vmem %s2070_s3, %s1473_s22 }
   0xe   : > { %s1530_s19 = scalar_lea.vmem %s2067_s0, %s1474_s16 }
   0xf   : > { %v192_v3 = vsub.s32 0, %v191_v1  ;;  %v244_v4 = vsub.s32 1, %v191_v1  ;;  %v296_v5 = vsub.s32 2, %v191_v1  ;;  %v349_v6 = vsub.s32 3, %v191_v1  ;;  %v174_v15 = vld [vmem:[%s1530_s19] sm:$0xff]  ;;  %v1213_v24 = vld [vmem:[%s1530_s19 + $0x18] sm:$0xff] }
  0x10   : > { %v401_v7 = vsub.s32 4, %v191_v1  ;;  %v453_v8 = vsub.s32 5, %v191_v1  ;;  %v506_v9 = vsub.s32 6, %v191_v1  ;;  %v558_v10 = vsub.s32 7, %v191_v1  ;;  %v226_v16 = vld [vmem:[%s1530_s19 + $0x1] sm:$0xff]  ;;  %v1229_v25 = vld [vmem:[%s1530_s19 + $0x19] sm:$0xff] }
  0x11   : > { %v1532_v11 = vrot.slane %v171_v2, %v192_v3  ;;  %v1534_v12 = vrot.slane %v171_v2, %v244_v4  ;;  %v1536_v13 = vrot.slane %v171_v2, %v296_v5  ;;  %v1538_v14 = vrot.slane %v171_v2, %v349_v6  ;;  %v278_v17 = vld [vmem:[%s1530_s19 + $0x2] sm:$0xff]  ;;  %v1245_v29 = vld [vmem:[%s1530_s19 + $0x1a] sm:$0xff]  ;;  %v279_v35 = vld [vmem:[%s1530_s19 + $0xa] sm:$0xff] }
  0x12   : > { %v1543_v18 = vrot.slane %v171_v2, %v401_v7  ;;  %v1545_v19 = vrot.slane %v171_v2, %v453_v8  ;;  %v1547_v20 = vrot.slane %v171_v2, %v506_v9  ;;  %v1554_v26 = vrot.slane %v171_v2, %v558_v10  ;;  %v175_v33 = vld [vmem:[%s1530_s19 + $0x8] sm:$0xff]  ;;  %v1261_v37 = vld [vmem:[%s1530_s19 + $0x30] sm:$0xff]  ;;  %v1214_v48 = vld [vmem:[%s1530_s19 + $0x20] sm:$0xff] }
  0x13   : > { %v194_v21 = vmul.f32 %v1532_v11, %v174_v15  ;;  %v246_v22 = vmul.f32 %v1534_v12, %v226_v16  ;;  %v298_v23 = vmul.f32 %v1536_v13, %v278_v17  ;;  %v351_v28 = vmul.f32 %v1213_v24, %v1538_v14  ;;  %v227_v34 = vld [vmem:[%s1530_s19 + $0x9] sm:$0xff]  ;;  %v1277_v38 = vld [vmem:[%s1530_s19 + $0x31] sm:$0xff]  ;;  %v1230_v49 = vld [vmem:[%s1530_s19 + $0x21] sm:$0xff] }
  0x14   : > { %v403_v31 = vmul.f32 %v1229_v25, %v1543_v18  ;;  %v455_v32 = vmul.f32 %v1245_v29, %v1545_v19  ;;  %v196_v36 = vmul.f32 %v1213_v24, %v1532_v11  ;;  %v1293_v39 = vld [vmem:[%s1530_s19 + $0x32] sm:$0xff]  ;;  %v195_v40 = vmul.f32 %v1532_v11, %v175_v33  ;;  %v1246_v50 = vld [vmem:[%s1530_s19 + $0x22] sm:$0xff]  ;;  %v1590_v58 = vld [vmem:[%s1530_s19 + $0x3a] sm:$0xff] }
  0x15   : > { %v262_v30 = vadd.f32 %v246_v22, %v194_v21  ;;  %v247_v41 = vmul.f32 %v1534_v12, %v227_v34  ;;  %v299_v42 = vmul.f32 %v1536_v13, %v279_v35  ;;  %v248_v43 = vmul.f32 %v1229_v25, %v1534_v12  ;;  %v1262_v56 = vld [vmem:[%s1530_s19 + $0x38] sm:$0xff]  ;;  %v1602_v7 = vld [vmem:[%s1530_s19 + $0x48] sm:$0xff] }
  0x16   : > { %v508_v45 = vmul.f32 %v1261_v37, %v1547_v20  ;;  %v560_v46 = vmul.f32 %v1277_v38, %v1554_v26  ;;  %v612_v47 = vmul.f32 %v1559_v27, %v1293_v39  ;;  %v352_v52 = vmul.f32 %v1214_v48, %v1538_v14  ;;  %v1587_v57 = vld [vmem:[%s1530_s19 + $0x39] sm:$0xff]  ;;  %v1605_v8 = vld [vmem:[%s1530_s19 + $0x49] sm:$0xff] }
  0x17   : > { %v314_v44 = vadd.f32 %v298_v23, %v262_v30  ;;  %v263_v51 = vadd.f32 %v247_v41, %v195_v40  ;;  %v404_v53 = vmul.f32 %v1230_v49, %v1543_v18  ;;  %v456_v54 = vmul.f32 %v1246_v50, %v1545_v19  ;;  %v1615_v23 = vld [vmem:[%s1530_s19 + $0x4a] sm:$0xff] }
  0x18   : > { %v264_v59 = vadd.f32 %v248_v43, %v196_v36  ;;  %v300_v60 = vmul.f32 %v1245_v29, %v1536_v13  ;;  %v353_v61 = vmul.f32 %v1261_v37, %v1538_v14  ;;  %v509_v63 = vmul.f32 %v1262_v56, %v1547_v20  ;;  %v1625_v36 = vld [vmem:[%s1530_s19 + $0x50] sm:$0xff] }
  0x19   : > { %v367_v55 = vadd.f32 %v351_v28, %v314_v44  ;;  %v315_v62 = vadd.f32 %v299_v42, %v263_v51  ;;  %v561_v0 = vmul.f32 %v1587_v57, %v1554_v26  ;;  %v613_v1 = vmul.f32 %v1559_v27, %v1590_v58  ;;  %v1280_v51 = vld [vmem:[%s1530_s19 + $0x51] sm:$0xff] }
  0x1a   : > { %v316_v3 = vadd.f32 %v300_v60, %v264_v59  ;;  %v405_v4 = vmul.f32 %v1277_v38, %v1543_v18  ;;  %v457_v5 = vmul.f32 %v1293_v39, %v1545_v19  ;;  %v197_v9 = vmul.f32 %v1214_v48, %v1532_v11  ;;  %v1636_v48 = vld [vmem:[%s2069_s2] ss:$0 sm:$0xff] }
  0x1b   : > { %v419_v2 = vadd.f32 %v403_v31, %v367_v55  ;;  %v368_v6 = vadd.f32 %v352_v52, %v315_v62  ;;  %v249_v10 = vmul.f32 %v1230_v49, %v1534_v12  ;;  %v301_v15 = vmul.f32 %v1246_v50, %v1536_v13  ;;  %v1296_v52 = vld [vmem:[%s1530_s19 + $0x52] sm:$0xff] }
  0x1c   : > { %v369_v17 = vadd.f32 %v353_v61, %v316_v3  ;;  %v510_v21 = vmul.f32 %v1602_v7, %v1547_v20  ;;  %v562_v22 = vmul.f32 %v1605_v8, %v1554_v26  ;;  %v614_v25 = vmul.f32 %v1559_v27, %v1615_v23 }
  0x1d   : > { %v471_v16 = vadd.f32 %v455_v32, %v419_v2  ;;  %v420_v24 = vadd.f32 %v404_v53, %v368_v6  ;;  %v265_v28 = vadd.f32 %v249_v10, %v197_v9  ;;  %v354_v29 = vmul.f32 %v1262_v56, %v1538_v14  ;;  %v1265_v6 = vld [vmem:[%s1530_s19 + $0x60] sm:$0xff] }
  0x1e   : > { %v421_v31 = vadd.f32 %v405_v4, %v369_v17  ;;  %v406_v32 = vmul.f32 %v1587_v57, %v1543_v18  ;;  %v458_v33 = vmul.f32 %v1590_v58, %v1545_v19  ;;  %v198_v40 = vmul.f32 %v1261_v37, %v1532_v11 }
  0x1f   : > { %v524_v30 = vadd.f32 %v508_v45, %v471_v16  ;;  %v472_v34 = vadd.f32 %v456_v54, %v420_v24  ;;  %v317_v35 = vadd.f32 %v301_v15, %v265_v28  ;;  %v250_v41 = vmul.f32 %v1277_v38, %v1534_v12 }
  0x20   : > { %v473_v43 = vadd.f32 %v457_v5, %v421_v31  ;;  %v511_v44 = vmul.f32 %v1625_v36, %v1547_v20  ;;  %v302_v45 = vmul.f32 %v1293_v39, %v1536_v13  ;;  %v355_v38 = vmul.f32 %v1602_v7, %v1538_v14 }
  0x21   : > { %v576_v42 = vadd.f32 %v560_v46, %v524_v30  ;;  %v525_v49 = vadd.f32 %v509_v63, %v472_v34  ;;  %v370_v50 = vadd.f32 %v354_v29, %v317_v35  ;;  %v266_v37 = vadd.f32 %v250_v41, %v198_v40  ;;  %v1297_v29 = vld [vmem:[%s1530_s19 + $0x62] sm:$0xff] }
  0x22   : > { %v526_v53 = vadd.f32 %v510_v21, %v473_v43  ;;  %v563_v54 = vmul.f32 %v1280_v51, %v1554_v26  ;;  %v615_v39 = vmul.f32 %v1559_v27, %v1296_v52  ;;  %v407_v61 = vmul.f32 %v1605_v8, %v1543_v18  ;;  %v1281_v21 = vld [vmem:[%s1530_s19 + $0x61] sm:$0xff] }
  0x23   : > { %v628_v46 = vadd.f32 %v612_v47, %v576_v42  ;;  %v577_v55 = vadd.f32 %v561_v0, %v525_v49  ;;  %v422_v59 = vadd.f32 %v406_v32, %v370_v50  ;;  %v318_v60 = vadd.f32 %v302_v45, %v266_v37  ;;  %v1266_v43 = vld [vmem:[%s1530_s19 + $0x68] sm:$0xff] }
  0x24   : > { %v578_v62 = vadd.f32 %v562_v22, %v526_v53  ;;  %v459_v63 = vmul.f32 %v1615_v23, %v1545_v19  ;;  %v199_v2 = vmul.f32 %v1262_v56, %v1532_v11  ;;  %v251_v0 = vmul.f32 %v1587_v57, %v1534_v12 }
  0x25   : > { %v650_v47 = vadd.f32 %v1636_v48, %v628_v46  ;;  %v629_v3 = vadd.f32 %v613_v1, %v577_v55  ;;  %v474_v4 = vadd.f32 %v458_v33, %v422_v59  ;;  %v371_v5 = vadd.f32 %v355_v38, %v318_v60  ;;  %v1298_v38 = vld [vmem:[%s1530_s19 + $0x6a] sm:$0xff] }
  0x26   : > { %v630_v9 = vadd.f32 %v614_v25, %v578_v62  ;;  %v512_v10 = vmul.f32 %v1265_v6, %v1547_v20  ;;  %v303_v15 = vmul.f32 %v1590_v58, %v1536_v13  ;;  %v356_v56 = vmul.f32 %v1625_v36, %v1538_v14 }
  0x27   : > { %666 = vst [vmem:[%s1647_s27] sm:$0xff] %v650_v47  ;;  %v651_v1 = vadd.f32 %v1636_v48, %v629_v3  ;;  %v527_v16 = vadd.f32 %v511_v44, %v474_v4  ;;  %v423_v17 = vadd.f32 %v407_v61, %v371_v5  ;;  %v267_v22 = vadd.f32 %v251_v0, %v199_v2  ;;  %v1283_v0 = vld [vmem:[%s1530_s19 + $0x79] sm:$0xff] }
  0x28   : > { %v652_v57 = vadd.f32 %v1636_v48, %v630_v9  ;;  %v564_v24 = vmul.f32 %v1281_v21, %v1554_v26  ;;  %v408_v58 = vmul.f32 %v1280_v51, %v1543_v18  ;;  %v616_v31 = vmul.f32 %v1559_v27, %v1297_v29 }
  0x29   : > { %667 = vst [vmem:[%s1647_s27 + $0x8] sm:$0xff] %v651_v1  ;;  %v579_v25 = vadd.f32 %v563_v54, %v527_v16  ;;  %v475_v28 = vadd.f32 %v459_v63, %v423_v17  ;;  %v319_v30 = vadd.f32 %v303_v15, %v267_v22  ;;  %v200_v32 = vmul.f32 %v1602_v7, %v1532_v11  ;;  %v1267_v63 = vld [vmem:[%s1530_s19 + $0x78] sm:$0xff] }
  0x2a   : > { %668 = vst [vmem:[%s1647_s27 + $0x10] sm:$0xff] %v652_v57  ;;  %v252_v33 = vmul.f32 %v1605_v8, %v1534_v12  ;;  %v304_v34 = vmul.f32 %v1615_v23, %v1536_v13  ;;  %v460_v42 = vmul.f32 %v1296_v52, %v1545_v19  ;;  %v513_v44 = vmul.f32 %v1266_v43, %v1547_v20  ;;  %v1282_v23 = vld [vmem:[%s1530_s19 + $0x69] sm:$0xff]  ;;  %v1299_v57 = vld [vmem:[%s1530_s19 + $0x7a] sm:$0xff] }
  0x2b   : > { %v631_v35 = vadd.f32 %v615_v39, %v579_v25  ;;  %v528_v40 = vadd.f32 %v512_v10, %v475_v28  ;;  %v372_v41 = vadd.f32 %v356_v56, %v319_v30  ;;  %v357_v49 = vmul.f32 %v1265_v6, %v1538_v14  ;;  %v1268_v25 = vld [vmem:[%s1530_s19 + $0x80] sm:$0xff] }
  0x2c   : > { %v268_v45 = vadd.f32 %v252_v33, %v200_v32  ;;  %v409_v37 = vmul.f32 %v1281_v21, %v1543_v18  ;;  %v201_v53 = vmul.f32 %v1625_v36, %v1532_v11  ;;  %v253_v54 = vmul.f32 %v1280_v51, %v1534_v12 }
  0x2d   : > { %v653_v7 = vadd.f32 %v1636_v48, %v631_v35  ;;  %v580_v50 = vadd.f32 %v564_v24, %v528_v40  ;;  %v424_v8 = vadd.f32 %v408_v58, %v372_v41  ;;  %v305_v39 = vmul.f32 %v1296_v52, %v1536_v13 }
  0x2e   : > { %v320_v46 = vadd.f32 %v304_v34, %v268_v45  ;;  %v565_v60 = vmul.f32 %v1282_v23, %v1554_v26  ;;  %v617_v61 = vmul.f32 %v1559_v27, %v1298_v38  ;;  %v461_v62 = vmul.f32 %v1297_v29, %v1545_v19 }
  0x2f   : > { %669 = vst [vmem:[%s1647_s27 + $0x18] sm:$0xff] %v653_v7  ;;  %v632_v55 = vadd.f32 %v616_v31, %v580_v50  ;;  %v476_v59 = vadd.f32 %v460_v42, %v424_v8  ;;  %v269_v2 = vadd.f32 %v253_v54, %v201_v53  ;;  %v358_v36 = vmul.f32 %v1266_v43, %v1538_v14  ;;  %v1300_v7 = vld [vmem:[%s1530_s19 + $0x82] sm:$0xff] }
  0x30   : > { %v373_v47 = vadd.f32 %v357_v49, %v320_v46  ;;  %v514_v3 = vmul.f32 %v1267_v63, %v1547_v20  ;;  %v410_v4 = vmul.f32 %v1282_v23, %v1543_v18  ;;  %v202_v10 = vmul.f32 %v1265_v6, %v1532_v11 }
  0x31   : > { %v654_v51 = vadd.f32 %v1636_v48, %v632_v55  ;;  %v529_v52 = vadd.f32 %v513_v44, %v476_v59  ;;  %v321_v9 = vadd.f32 %v305_v39, %v269_v2  ;;  %v254_v15 = vmul.f32 %v1281_v21, %v1534_v12  ;;  %v1285_v59 = vld [vmem:[%s1530_s19 + $0x91] sm:$0xff] }
  0x32   : > { %v425_v5 = vadd.f32 %v409_v37, %v373_v47  ;;  %v566_v1 = vmul.f32 %v1283_v0, %v1554_v26  ;;  %v462_v16 = vmul.f32 %v1298_v38, %v1545_v19  ;;  %v306_v17 = vmul.f32 %v1297_v29, %v1536_v13  ;;  %v1284_v29 = vld [vmem:[%s1530_s19 + $0x81] sm:$0xff]  ;;  %v1269_v37 = vld [vmem:[%s1530_s19 + $0x90] sm:$0xff] }
  0x33   : > { %670 = vst [vmem:[%s1647_s27 + $0x20] sm:$0xff] %v654_v51  ;;  %v581_v56 = vadd.f32 %v565_v60, %v529_v52  ;;  %v374_v24 = vadd.f32 %v358_v36, %v321_v9  ;;  %v270_v28 = vadd.f32 %v254_v15, %v202_v10  ;;  %v359_v30 = vmul.f32 %v1267_v63, %v1538_v14  ;;  %v1270_v9 = vld [vmem:[%s1530_s19 + $0x98] sm:$0xff] }
  0x34   : > { %v477_v22 = vadd.f32 %v461_v62, %v425_v5  ;;  %v618_v21 = vmul.f32 %v1559_v27, %v1299_v57  ;;  %v515_v58 = vmul.f32 %v1268_v25, %v1547_v20  ;;  %v411_v31 = vmul.f32 %v1283_v0, %v1543_v18 }
  0x35   : > { %v633_v6 = vadd.f32 %v617_v61, %v581_v56  ;;  %v426_v33 = vadd.f32 %v410_v4, %v374_v24  ;;  %v322_v34 = vadd.f32 %v306_v17, %v270_v28  ;;  %v203_v35 = vmul.f32 %v1266_v43, %v1532_v11 }
  0x36   : > { %v530_v32 = vadd.f32 %v514_v3, %v477_v22  ;;  %v567_v41 = vmul.f32 %v1284_v29, %v1554_v26  ;;  %v255_v42 = vmul.f32 %v1282_v23, %v1534_v12  ;;  %v307_v44 = vmul.f32 %v1298_v38, %v1536_v13  ;;  %v1301_v3 = vld [vmem:[%s1530_s19 + $0x92] sm:$0xff] }
  0x37   : > { %v655_v40 = vadd.f32 %v1636_v48, %v633_v6  ;;  %v478_v49 = vadd.f32 %v462_v16, %v426_v33  ;;  %v375_v50 = vadd.f32 %v359_v30, %v322_v34  ;;  %v463_v8 = vmul.f32 %v1299_v57, %v1545_v19  ;;  %v1286_v30 = vld [vmem:[%s1530_s19 + $0x99] sm:$0xff] }
  0x38   : > { %v582_v45 = vadd.f32 %v566_v1, %v530_v32  ;;  %v619_v46 = vmul.f32 %v1559_v27, %v1300_v7  ;;  %v516_v43 = vmul.f32 %v1269_v37, %v1547_v20  ;;  %v271_v53 = vadd.f32 %v255_v42, %v203_v35  ;;  %v1302_v32 = vld [vmem:[%s1530_s19 + $0x9a] sm:$0xff] }
  0x39   : > { %671 = vst [vmem:[%s1647_s27 + $0x28] sm:$0xff] %v655_v40  ;;  %v360_v54 = vmul.f32 %v1268_v25, %v1538_v14  ;;  %v531_v38 = vadd.f32 %v515_v58, %v478_v49  ;;  %v427_v39 = vadd.f32 %v411_v31, %v375_v50  ;;  %v412_v55 = vmul.f32 %v1284_v29, %v1543_v18  ;;  %v1271_v40 = vld [vmem:[%s1530_s19 + $0xa8] sm:$0xff] }
  0x3a   : > { %v634_v23 = vadd.f32 %v618_v21, %v582_v45  ;;  %v323_v60 = vadd.f32 %v307_v44, %v271_v53  ;;  %v204_v61 = vmul.f32 %v1267_v63, %v1532_v11  ;;  %v256_v47 = vmul.f32 %v1283_v0, %v1534_v12  ;;  %v1287_v50 = vld [vmem:[%s1530_s19 + $0xa9] sm:$0xff] }
  0x3b   : > { %v308_v62 = vmul.f32 %v1299_v57, %v1536_v13  ;;  %v583_v36 = vadd.f32 %v567_v41, %v531_v38  ;;  %v479_v51 = vadd.f32 %v463_v8, %v427_v39  ;;  %v568_v52 = vmul.f32 %v1285_v59, %v1554_v26  ;;  %v1303_v39 = vld [vmem:[%s1530_s19 + $0xaa] sm:$0xff] }
  0x3c   : > { %v656_v2 = vadd.f32 %v1636_v48, %v634_v23  ;;  %v376_v4 = vadd.f32 %v360_v54, %v323_v60  ;;  %v464_v5 = vmul.f32 %v1300_v7, %v1545_v19  ;;  %v272_v10 = vadd.f32 %v256_v47, %v204_v61  ;;  %v1272_v61 = vld [vmem:[%s1530_s19 + $0xb0] sm:$0xff] }
  0x3d   : > { %v361_v15 = vmul.f32 %v1269_v37, %v1538_v14  ;;  %v635_v63 = vadd.f32 %v619_v46, %v583_v36  ;;  %v532_v0 = vadd.f32 %v516_v43, %v479_v51  ;;  %v620_v56 = vmul.f32 %v1559_v27, %v1301_v3 }
  0x3e   : > { %672 = vst [vmem:[%s1647_s27 + $0x30] sm:$0xff] %v656_v2  ;;  %v517_v1 = vmul.f32 %v1270_v9, %v1547_v20  ;;  %v428_v16 = vadd.f32 %v412_v55, %v376_v4  ;;  %v324_v17 = vadd.f32 %v308_v62, %v272_v10  ;;  %v413_v22 = vmul.f32 %v1285_v59, %v1543_v18 }
  0x3f   : > { %v205_v57 = vmul.f32 %v1268_v25, %v1532_v11  ;;  %v657_v24 = vadd.f32 %v1636_v48, %v635_v63  ;;  %v584_v28 = vadd.f32 %v568_v52, %v532_v0  ;;  %v257_v6 = vmul.f32 %v1284_v29, %v1534_v12 }
  0x40   : > { %v309_v21 = vmul.f32 %v1300_v7, %v1536_v13  ;;  %v480_v58 = vadd.f32 %v464_v5, %v428_v16  ;;  %v569_v31 = vmul.f32 %v1286_v30, %v1554_v26  ;;  %v377_v33 = vadd.f32 %v361_v15, %v324_v17  ;;  %v1288_v15 = vld [vmem:[%s1530_s19 + $0xb1] sm:$0xff] }
  0x41   : > { %v465_v34 = vmul.f32 %v1301_v3, %v1545_v19  ;;  %673 = vst [vmem:[%s1647_s27 + $0x38] sm:$0xff] %v657_v24  ;;  %v636_v35 = vadd.f32 %v620_v56, %v584_v28  ;;  %v621_v25 = vmul.f32 %v1559_v27, %v1302_v32  ;;  %v273_v41 = vadd.f32 %v257_v6, %v205_v57  ;;  %v1304_v16 = vld [vmem:[%s1530_s19 + $0xb2] sm:$0xff]  ;;  %v1273_v24 = vld [vmem:[%s1530_s19 + $0xc0] sm:$0xff] }
  0x42   : > { %v362_v29 = vmul.f32 %v1270_v9, %v1538_v14  ;;  %v533_v42 = vadd.f32 %v517_v1, %v480_v58  ;;  %v429_v44 = vadd.f32 %v413_v22, %v377_v33  ;;  %v518_v45 = vmul.f32 %v1271_v40, %v1547_v20  ;;  %v1289_v33 = vld [vmem:[%s1530_s19 + $0xc1] sm:$0xff] }
  0x43   : > { %v414_v49 = vmul.f32 %v1286_v30, %v1543_v18  ;;  %v658_v7 = vadd.f32 %v1636_v48, %v636_v35  ;;  %v325_v8 = vadd.f32 %v309_v21, %v273_v41  ;;  %v206_v46 = vmul.f32 %v1269_v37, %v1532_v11 }
  0x44   : > { %v258_v43 = vmul.f32 %v1285_v59, %v1534_v12  ;;  %v585_v53 = vadd.f32 %v569_v31, %v533_v42  ;;  %v481_v54 = vadd.f32 %v465_v34, %v429_v44  ;;  %v570_v23 = vmul.f32 %v1287_v50, %v1554_v26 }
  0x45   : > { %v310_v38 = vmul.f32 %v1301_v3, %v1536_v13  ;;  %674 = vst [vmem:[%s1647_s27 + $0x40] sm:$0xff] %v658_v7  ;;  %v378_v55 = vadd.f32 %v362_v29, %v325_v8  ;;  %v466_v60 = vmul.f32 %v1302_v32, %v1545_v19  ;;  %v363_v62 = vmul.f32 %v1271_v40, %v1538_v14  ;;  %v1274_v8 = vld [vmem:[%s1530_s19 + $0xc8] sm:$0xff] }
  0x46   : > { %v274_v47 = vadd.f32 %v258_v43, %v206_v46  ;;  %v637_v37 = vadd.f32 %v621_v25, %v585_v53  ;;  %v534_v2 = vadd.f32 %v518_v45, %v481_v54  ;;  %v622_v59 = vmul.f32 %v1559_v27, %v1303_v39  ;;  %v1305_v45 = vld [vmem:[%s1530_s19 + $0xc2] sm:$0xff] }
  0x47   : > { %v519_v36 = vmul.f32 %v1272_v61, %v1547_v20  ;;  %v430_v51 = vadd.f32 %v414_v49, %v378_v55  ;;  %v415_v3 = vmul.f32 %v1287_v50, %v1543_v18  ;;  %v207_v4 = vmul.f32 %v1270_v9, %v1532_v11 }
  0x48   : > { %v326_v52 = vadd.f32 %v310_v38, %v274_v47  ;;  %v659_v5 = vadd.f32 %v1636_v48, %v637_v37  ;;  %v586_v10 = vadd.f32 %v570_v23, %v534_v2  ;;  %v259_v63 = vmul.f32 %v1286_v30, %v1534_v12 }
  0x49   : > { %v311_v0 = vmul.f32 %v1302_v32, %v1536_v13  ;;  %v482_v56 = vadd.f32 %v466_v60, %v430_v51  ;;  %v571_v1 = vmul.f32 %v1288_v15, %v1554_v26  ;;  %v467_v22 = vmul.f32 %v1303_v39, %v1545_v19  ;;  %v1306_v51 = vld [vmem:[%s1530_s19 + $0xca] sm:$0xff] }
  0x4a   : > { %v379_v17 = vadd.f32 %v363_v62, %v326_v52  ;;  %675 = vst [vmem:[%s1647_s27 + $0x48] sm:$0xff] %v659_v5  ;;  %v638_v57 = vadd.f32 %v622_v59, %v586_v10  ;;  %v623_v9 = vmul.f32 %v1559_v27, %v1304_v16  ;;  %v275_v28 = vadd.f32 %v259_v63, %v207_v4  ;;  %v1290_v62 = vld [vmem:[%s1530_s19 + $0xc9] sm:$0xff]  ;;  %v1275_v5 = vld [vmem:[%s1530_s19 + $0xd8] sm:$0xff] }
  0x4b   : > { %v364_v30 = vmul.f32 %v1272_v61, %v1538_v14  ;;  %v535_v6 = vadd.f32 %v519_v36, %v482_v56  ;;  %v520_v58 = vmul.f32 %v1273_v24, %v1547_v20  ;;  %v416_v31 = vmul.f32 %v1288_v15, %v1543_v18 }
  0x4c   : > { %v431_v21 = vadd.f32 %v415_v3, %v379_v17  ;;  %v660_v32 = vadd.f32 %v1636_v48, %v638_v57  ;;  %v327_v34 = vadd.f32 %v311_v0, %v275_v28  ;;  %v208_v35 = vmul.f32 %v1271_v40, %v1532_v11  ;;  %v1291_v17 = vld [vmem:[%s1530_s19 + $0xd9] sm:$0xff] }
  0x4d   : > { %v260_v25 = vmul.f32 %v1287_v50, %v1534_v12  ;;  %v587_v41 = vadd.f32 %v571_v1, %v535_v6  ;;  %v572_v42 = vmul.f32 %v1289_v33, %v1554_v26  ;;  %v312_v44 = vmul.f32 %v1303_v39, %v1536_v13 }
  0x4e   : > { %v483_v29 = vadd.f32 %v467_v22, %v431_v21  ;;  %676 = vst [vmem:[%s1647_s27 + $0x50] sm:$0xff] %v660_v32  ;;  %v380_v49 = vadd.f32 %v364_v30, %v327_v34  ;;  %v468_v7 = vmul.f32 %v1304_v16, %v1545_v19  ;;  %v365_v43 = vmul.f32 %v1273_v24, %v1538_v14  ;;  %v1276_v34 = vld [vmem:[%s1530_s19 + $0xe0] sm:$0xff] }
  0x4f   : > { %v276_v46 = vadd.f32 %v260_v25, %v208_v35  ;;  %v639_v40 = vadd.f32 %v623_v9, %v587_v41  ;;  %v624_v50 = vmul.f32 %v1559_v27, %v1305_v45  ;;  %v521_v54 = vmul.f32 %v1274_v8, %v1547_v20 }
  0x50   : > { %v536_v53 = vadd.f32 %v520_v58, %v483_v29  ;;  %v432_v23 = vadd.f32 %v416_v31, %v380_v49  ;;  %v417_v39 = vmul.f32 %v1289_v33, %v1543_v18  ;;  %v209_v55 = vmul.f32 %v1272_v61, %v1532_v11  ;;  %v1307_v58 = vld [vmem:[%s1530_s19 + $0xda] sm:$0xff] }
  0x51   : > { %v328_v38 = vadd.f32 %v312_v44, %v276_v46  ;;  %v661_v60 = vadd.f32 %v1636_v48, %v639_v40  ;;  %v261_v37 = vmul.f32 %v1288_v15, %v1534_v12  ;;  %v313_v2 = vmul.f32 %v1304_v16, %v1536_v13 }
  0x52   : > { %v588_v47 = vadd.f32 %v572_v42, %v536_v53  ;;  %v484_v59 = vadd.f32 %v468_v7, %v432_v23  ;;  %v573_v36 = vmul.f32 %v1290_v62, %v1554_v26  ;;  %v469_v3 = vmul.f32 %v1305_v45, %v1545_v19  ;;  %v1308_v23 = vld [vmem:[%s1530_s19 + $0xe2] sm:$0xff] }
  0x53   : > { %v381_v52 = vadd.f32 %v365_v43, %v328_v38  ;;  %677 = vst [vmem:[%s1647_s27 + $0x58] sm:$0xff] %v661_v60  ;;  %v625_v61 = vmul.f32 %v1559_v27, %v1306_v51  ;;  %v277_v10 = vadd.f32 %v261_v37, %v209_v55  ;;  %v366_v15 = vmul.f32 %v1274_v8, %v1538_v14  ;;  %v1292_v43 = vld [vmem:[%s1530_s19 + $0xe1] sm:$0xff]  ;;  %v1407_v60 = vld [vmem:[%s1530_s19 + $0xf0] sm:$0xff] }
  0x54   : > { %v640_v4 = vadd.f32 %v624_v50, %v588_v47  ;;  %v537_v63 = vadd.f32 %v521_v54, %v484_v59  ;;  %v522_v56 = vmul.f32 %v1275_v5, %v1547_v20  ;;  %v418_v1 = vmul.f32 %v1290_v62, %v1543_v18 }
  0x55   : > { %v433_v0 = vadd.f32 %v417_v39, %v381_v52  ;;  %v329_v22 = vadd.f32 %v313_v2, %v277_v10  ;;  %v699_v57 = vmul.f32 %v1273_v24, %v1532_v11  ;;  %v747_v9 = vmul.f32 %v1289_v33, %v1534_v12  ;;  %v1423_v52 = vld [vmem:[%s1530_s19 + $0xf1] sm:$0xff] }
  0x56   : > { %v662_v16 = vadd.f32 %v1636_v48, %v640_v4  ;;  %v589_v28 = vadd.f32 %v573_v36, %v537_v63  ;;  %v574_v6 = vmul.f32 %v1291_v17, %v1554_v26  ;;  %v795_v21 = vmul.f32 %v1305_v45, %v1536_v13 }
  0x57   : > { %v485_v30 = vadd.f32 %v469_v3, %v433_v0  ;;  %v382_v31 = vadd.f32 %v366_v15, %v329_v22  ;;  %v470_v32 = vmul.f32 %v1306_v51, %v1545_v19  ;;  %v763_v35 = vadd.f32 %v747_v9, %v699_v57  ;;  %v1408_v22 = vld [vmem:[%s1530_s19 + $0xf8] sm:$0xff] }
  0x58   : > { %678 = vst [vmem:[%s1647_s27 + $0x60] sm:$0xff] %v662_v16  ;;  %v844_v25 = vmul.f32 %v1275_v5, %v1538_v14  ;;  %v641_v24 = vadd.f32 %v625_v61, %v589_v28  ;;  %v626_v33 = vmul.f32 %v1559_v27, %v1307_v58  ;;  %v523_v29 = vmul.f32 %v1276_v34, %v1547_v20 }
  0x59   : > { %v538_v41 = vadd.f32 %v522_v56, %v485_v30  ;;  %v434_v42 = vadd.f32 %v418_v1, %v382_v31  ;;  %v811_v44 = vadd.f32 %v795_v21, %v763_v35  ;;  %v892_v45 = vmul.f32 %v1291_v17, %v1543_v18  ;;  %v1439_v56 = vld [vmem:[%s1530_s19 + $0xf2] sm:$0xff] }
  0x5a   : > { %v700_v49 = vmul.f32 %v1274_v8, %v1532_v11  ;;  %v663_v7 = vadd.f32 %v1636_v48, %v641_v24  ;;  %v748_v40 = vmul.f32 %v1290_v62, %v1534_v12  ;;  %v796_v53 = vmul.f32 %v1306_v51, %v1536_v13 }
  0x5b   : > { %v590_v46 = vadd.f32 %v574_v6, %v538_v41  ;;  %v486_v50 = vadd.f32 %v470_v32, %v434_v42  ;;  %v575_v54 = vmul.f32 %v1292_v43, %v1554_v26  ;;  %v860_v38 = vadd.f32 %v844_v25, %v811_v44  ;;  %v1424_v25 = vld [vmem:[%s1530_s19 + $0xf9] sm:$0xff] }
  0x5c   : > { %v940_v39 = vmul.f32 %v1307_v58, %v1545_v19  ;;  %679 = vst [vmem:[%s1647_s27 + $0x68] sm:$0xff] %v663_v7  ;;  %v627_v8 = vmul.f32 %v1559_v27, %v1308_v23  ;;  %v764_v47 = vadd.f32 %v748_v40, %v700_v49  ;;  %v845_v62 = vmul.f32 %v1276_v34, %v1538_v14  ;;  %v1440_v42 = vld [vmem:[%s1530_s19 + $0xfa] sm:$0xff]  ;;  %v1409_v7 = vld [vmem:[%s1530_s19 + $0x108] sm:$0xff] }
  0x5d   : > { %v642_v55 = vadd.f32 %v626_v33, %v590_v46  ;;  %v539_v37 = vadd.f32 %v523_v29, %v486_v50  ;;  %v908_v2 = vadd.f32 %v892_v45, %v860_v38  ;;  %v989_v59 = vmul.f32 %v1407_v60, %v1547_v20  ;;  %v1425_v38 = vld [vmem:[%s1530_s19 + $0x109] sm:$0xff] }
  0x5e   : > { %v893_v36 = vmul.f32 %v1292_v43, %v1543_v18  ;;  %v812_v3 = vadd.f32 %v796_v53, %v764_v47  ;;  %v701_v4 = vmul.f32 %v1275_v5, %v1532_v11  ;;  %v749_v61 = vmul.f32 %v1291_v17, %v1534_v12 }
  0x5f   : > { %v664_v51 = vadd.f32 %v1636_v48, %v642_v55  ;;  %v591_v10 = vadd.f32 %v575_v54, %v539_v37  ;;  %v956_v15 = vadd.f32 %v940_v39, %v908_v2  ;;  %v1037_v63 = vmul.f32 %v1423_v52, %v1554_v26 }
  0x60   : > { %v797_v0 = vmul.f32 %v1307_v58, %v1536_v13  ;;  %v861_v1 = vadd.f32 %v845_v62, %v812_v3  ;;  %v941_v16 = vmul.f32 %v1308_v23, %v1545_v19  ;;  %v765_v57 = vadd.f32 %v749_v61, %v701_v4  ;;  %v1410_v3 = vld [vmem:[%s1530_s19 + $0x110] sm:$0xff] }
  0x61   : > { %680 = vst [vmem:[%s1647_s27 + $0x70] sm:$0xff] %v664_v51  ;;  %v846_v9 = vmul.f32 %v1407_v60, %v1538_v14  ;;  %v643_v5 = vadd.f32 %v627_v8, %v591_v10  ;;  %v1005_v28 = vadd.f32 %v989_v59, %v956_v15  ;;  %v1085_v17 = vmul.f32 %v1439_v56, %v1559_v27  ;;  %v1441_v59 = vld [vmem:[%s1530_s19 + $0x10a] sm:$0xff] }
  0x62   : > { %v990_v30 = vmul.f32 %v1408_v22, %v1547_v20  ;;  %v909_v6 = vadd.f32 %v893_v36, %v861_v1  ;;  %v813_v21 = vadd.f32 %v797_v0, %v765_v57  ;;  %v894_v58 = vmul.f32 %v1423_v52, %v1543_v18 }
  0x63   : > { %v702_v31 = vmul.f32 %v1276_v34, %v1532_v11  ;;  %v665_v32 = vadd.f32 %v1636_v48, %v643_v5  ;;  %v1053_v35 = vadd.f32 %v1037_v63, %v1005_v28  ;;  %v750_v24 = vmul.f32 %v1292_v43, %v1534_v12 }
  0x64   : > { %v798_v41 = vmul.f32 %v1308_v23, %v1536_v13  ;;  %v957_v33 = vadd.f32 %v941_v16, %v909_v6  ;;  %v1038_v29 = vmul.f32 %v1424_v25, %v1554_v26  ;;  %v862_v44 = vadd.f32 %v846_v9, %v813_v21  ;;  %v1426_v9 = vld [vmem:[%s1530_s19 + $0x111] sm:$0xff] }
  0x65   : > { %v942_v45 = vmul.f32 %v1439_v56, %v1545_v19  ;;  %681 = vst [vmem:[%s1647_s27 + $0x78] sm:$0xff] %v665_v32  ;;  %v1101_v49 = vadd.f32 %v1085_v17, %v1053_v35  ;;  %v1086_v34 = vmul.f32 %v1440_v42, %v1559_v27  ;;  %v766_v46 = vadd.f32 %v750_v24, %v702_v31  ;;  %v1442_v6 = vld [vmem:[%s1530_s19 + $0x112] sm:$0xff]  ;;  %v1411_v32 = vld [vmem:[%s1530_s19 + $0x120] sm:$0xff] }
  0x66   : > { %v847_v43 = vmul.f32 %v1408_v22, %v1538_v14  ;;  %v1006_v40 = vadd.f32 %v990_v30, %v957_v33  ;;  %v910_v53 = vadd.f32 %v894_v58, %v862_v44  ;;  %v991_v50 = vmul.f32 %v1409_v7, %v1547_v20  ;;  %v1427_v44 = vld [vmem:[%s1530_s19 + $0x121] sm:$0xff] }
  0x67   : > { %v895_v54 = vmul.f32 %v1424_v25, %v1543_v18  ;;  %v1117_v23 = vadd.f32 %v1636_v48, %v1101_v49  ;;  %v814_v39 = vadd.f32 %v798_v41, %v766_v46  ;;  %v703_v55 = vmul.f32 %v1407_v60, %v1532_v11 }
  0x68   : > { %v751_v8 = vmul.f32 %v1423_v52, %v1534_v12  ;;  %v1054_v47 = vadd.f32 %v1038_v29, %v1006_v40  ;;  %v958_v62 = vadd.f32 %v942_v45, %v910_v53  ;;  %v1039_v37 = vmul.f32 %v1425_v38, %v1554_v26 }
  0x69   : > { %v799_v2 = vmul.f32 %v1439_v56, %v1536_v13  ;;  %1455 = vst [vmem:[%s1647_s27 + $0x80] sm:$0xff] %v1117_v23  ;;  %v863_v36 = vadd.f32 %v847_v43, %v814_v39  ;;  %v943_v51 = vmul.f32 %v1440_v42, %v1545_v19  ;;  %v848_v61 = vmul.f32 %v1409_v7, %v1538_v14  ;;  %v1412_v39 = vld [vmem:[%s1530_s19 + $0x128] sm:$0xff] }
  0x6a   : > { %v767_v4 = vadd.f32 %v751_v8, %v703_v55  ;;  %v1102_v60 = vadd.f32 %v1086_v34, %v1054_v47  ;;  %v1007_v10 = vadd.f32 %v991_v50, %v958_v62  ;;  %v1087_v52 = vmul.f32 %v1441_v59, %v1559_v27  ;;  %v1443_v50 = vld [vmem:[%s1530_s19 + $0x122] sm:$0xff] }
  0x6b   : > { %v992_v15 = vmul.f32 %v1410_v3, %v1547_v20  ;;  %v911_v63 = vadd.f32 %v895_v54, %v863_v36  ;;  %v896_v56 = vmul.f32 %v1425_v38, %v1543_v18  ;;  %v704_v1 = vmul.f32 %v1408_v22, %v1532_v11 }
  0x6c   : > { %v815_v0 = vadd.f32 %v799_v2, %v767_v4  ;;  %v1118_v16 = vadd.f32 %v1636_v48, %v1102_v60  ;;  %v1055_v57 = vadd.f32 %v1039_v37, %v1007_v10  ;;  %v752_v5 = vmul.f32 %v1424_v25, %v1534_v12 }
  0x6d   : > { %v800_v28 = vmul.f32 %v1440_v42, %v1536_v13  ;;  %v959_v17 = vadd.f32 %v943_v51, %v911_v63  ;;  %v1040_v30 = vmul.f32 %v1426_v9, %v1554_v26  ;;  %v944_v58 = vmul.f32 %v1441_v59, %v1545_v19  ;;  %v1444_v63 = vld [vmem:[%s1530_s19 + $0x12a] sm:$0xff] }
  0x6e   : > { %v864_v21 = vadd.f32 %v848_v61, %v815_v0  ;;  %1456 = vst [vmem:[%s1647_s27 + $0x88] sm:$0xff] %v1118_v16  ;;  %v1103_v31 = vadd.f32 %v1087_v52, %v1055_v57  ;;  %v1088_v22 = vmul.f32 %v1442_v6, %v1559_v27  ;;  %v768_v35 = vadd.f32 %v752_v5, %v704_v1  ;;  %v1428_v61 = vld [vmem:[%s1530_s19 + $0x129] sm:$0xff]  ;;  %v1413_v16 = vld [vmem:[%s1530_s19 + $0x138] sm:$0xff] }
  0x6f   : > { %v849_v25 = vmul.f32 %v1410_v3, %v1538_v14  ;;  %v1008_v24 = vadd.f32 %v992_v15, %v959_v17  ;;  %v993_v33 = vmul.f32 %v1411_v32, %v1547_v20  ;;  %v897_v29 = vmul.f32 %v1426_v9, %v1543_v18 }
  0x70   : > { %v912_v41 = vadd.f32 %v896_v56, %v864_v21  ;;  %v1119_v42 = vadd.f32 %v1636_v48, %v1103_v31  ;;  %v816_v45 = vadd.f32 %v800_v28, %v768_v35  ;;  %v705_v49 = vmul.f32 %v1409_v7, %v1532_v11  ;;  %v1429_v21 = vld [vmem:[%s1530_s19 + $0x139] sm:$0xff] }
  0x71   : > { %v753_v34 = vmul.f32 %v1425_v38, %v1534_v12  ;;  %v1056_v46 = vadd.f32 %v1040_v30, %v1008_v24  ;;  %v1041_v40 = vmul.f32 %v1427_v44, %v1554_v26  ;;  %v801_v53 = vmul.f32 %v1441_v59, %v1536_v13 }
  0x72   : > { %v960_v43 = vadd.f32 %v944_v58, %v912_v41  ;;  %1457 = vst [vmem:[%s1647_s27 + $0x90] sm:$0xff] %v1119_v42  ;;  %v865_v54 = vadd.f32 %v849_v25, %v816_v45  ;;  %v945_v23 = vmul.f32 %v1442_v6, %v1545_v19  ;;  %v850_v8 = vmul.f32 %v1411_v32, %v1538_v14  ;;  %v1445_v41 = vld [vmem:[%s1530_s19 + $0x13a] sm:$0xff] }
  0x73   : > { %v769_v55 = vadd.f32 %v753_v34, %v705_v49  ;;  %v1104_v7 = vadd.f32 %v1088_v22, %v1056_v46  ;;  %v1089_v38 = vmul.f32 %v1443_v50, %v1559_v27  ;;  %v994_v62 = vmul.f32 %v1412_v39, %v1547_v20  ;;  %v1414_v42 = vld [vmem:[%s1530_s19 + $0x140] sm:$0xff] }
  0x74   : > { %v1009_v47 = vadd.f32 %v993_v33, %v960_v43  ;;  %v913_v37 = vadd.f32 %v897_v29, %v865_v54  ;;  %v898_v59 = vmul.f32 %v1427_v44, %v1543_v18  ;;  %v706_v36 = vmul.f32 %v1410_v3, %v1532_v11 }
  0x75   : > { %v817_v2 = vadd.f32 %v801_v53, %v769_v55  ;;  %v1120_v51 = vadd.f32 %v1636_v48, %v1104_v7  ;;  %v754_v60 = vmul.f32 %v1426_v9, %v1534_v12  ;;  %v802_v10 = vmul.f32 %v1442_v6, %v1536_v13 }
  0x76   : > { %v1057_v4 = vadd.f32 %v1041_v40, %v1009_v47  ;;  %v961_v52 = vadd.f32 %v945_v23, %v913_v37  ;;  %v1042_v15 = vmul.f32 %v1428_v61, %v1554_v26  ;;  %v946_v56 = vmul.f32 %v1443_v50, %v1545_v19  ;;  %v1446_v37 = vld [vmem:[%s1530_s19 + $0x142] sm:$0xff] }
  0x77   : > { %v866_v0 = vadd.f32 %v850_v8, %v817_v2  ;;  %1458 = vst [vmem:[%s1647_s27 + $0x98] sm:$0xff] %v1120_v51  ;;  %v1090_v3 = vmul.f32 %v1444_v63, %v1559_v27  ;;  %v770_v57 = vadd.f32 %v754_v60, %v706_v36  ;;  %v851_v9 = vmul.f32 %v1412_v39, %v1538_v14  ;;  %v1430_v8 = vld [vmem:[%s1530_s19 + $0x141] sm:$0xff]  ;;  %v1415_v51 = vld [vmem:[%s1530_s19 + $0x150] sm:$0xff] }
  0x78   : > { %v1105_v1 = vadd.f32 %v1089_v38, %v1057_v4  ;;  %v1010_v5 = vadd.f32 %v994_v62, %v961_v52  ;;  %v995_v17 = vmul.f32 %v1413_v16, %v1547_v20  ;;  %v899_v30 = vmul.f32 %v1428_v61, %v1543_v18 }
  0x79   : > { %v914_v28 = vadd.f32 %v898_v59, %v866_v0  ;;  %v818_v58 = vadd.f32 %v802_v10, %v770_v57  ;;  %v707_v31 = vmul.f32 %v1411_v32, %v1532_v11  ;;  %v755_v27 = vmul.f32 %v1427_v44, %v1534_v12  ;;  %v1937_v44 = vld [vmem:[%s2068_s1 + $0x8] ss:$0 sm:$0xff]  ;;  %v1431_v0 = vld [vmem:[%s1530_s19 + $0x151] sm:$0xff] }
  0x7a   : > { %v1121_v6 = vadd.f32 %v1636_v48, %v1105_v1  ;;  %v1058_v22 = vadd.f32 %v1042_v15, %v1010_v5  ;;  %v1043_v25 = vmul.f32 %v1429_v21, %v1554_v26  ;;  %v803_v24 = vmul.f32 %v1443_v50, %v1536_v13 }
  0x7b   : > { %v962_v35 = vadd.f32 %v946_v56, %v914_v28  ;;  %v867_v33 = vadd.f32 %v851_v9, %v818_v58  ;;  %v947_v29 = vmul.f32 %v1444_v63, %v1545_v19  ;;  %v771_v45 = vadd.f32 %v755_v27, %v707_v31  ;;  %v1416_v58 = vld [vmem:[%s1530_s19 + $0x158] sm:$0xff] }
  0x7c   : > { %1459 = vst [vmem:[%s1647_s27 + $0xa0] sm:$0xff] %v1121_v6  ;;  %v852_v49 = vmul.f32 %v1413_v16, %v1538_v14  ;;  %v1106_v34 = vadd.f32 %v1090_v3, %v1058_v22  ;;  %v1091_v46 = vmul.f32 %v1937_v44, %v1445_v41  ;;  %v996_v43 = vmul.f32 %v1414_v42, %v1547_v20 }
  0x7d   : > { %v1011_v32 = vadd.f32 %v995_v17, %v962_v35  ;;  %v915_v40 = vadd.f32 %v899_v30, %v867_v33  ;;  %v819_v53 = vadd.f32 %v803_v24, %v771_v45  ;;  %v900_v50 = vmul.f32 %v1429_v21, %v1543_v18  ;;  %v1447_v17 = vld [vmem:[%s1530_s19 + $0x152] sm:$0xff] }
  0x7e   : > { %v708_v54 = vmul.f32 %v1412_v39, %v1532_v11  ;;  %v1122_v23 = vadd.f32 %v1636_v48, %v1106_v34  ;;  %v756_v7 = vmul.f32 %v1428_v61, %v1534_v12  ;;  %v804_v47 = vmul.f32 %v1444_v63, %v1536_v13 }
  0x7f   : > { %v1059_v55 = vadd.f32 %v1043_v25, %v1011_v32  ;;  %v963_v38 = vadd.f32 %v947_v29, %v915_v40  ;;  %v1044_v62 = vmul.f32 %v1430_v8, %v1554_v26  ;;  %v868_v2 = vadd.f32 %v852_v49, %v819_v53  ;;  %v1432_v49 = vld [vmem:[%s1530_s19 + $0x159] sm:$0xff] }
  0x80   : > { %v948_v59 = vmul.f32 %v1445_v41, %v1545_v19  ;;  %1460 = vst [vmem:[%s1647_s27 + $0xa8] sm:$0xff] %v1122_v23  ;;  %v1092_v39 = vmul.f32 %v1937_v44, %v1446_v37  ;;  %v772_v4 = vadd.f32 %v756_v7, %v708_v54  ;;  %v853_v61 = vmul.f32 %v1414_v42, %v1538_v14  ;;  %v1448_v40 = vld [vmem:[%s1530_s19 + $0x15a] sm:$0xff]  ;;  %v1417_v23 = vld [vmem:[%s1530_s19 + $0x168] sm:$0xff] }
  0x81   : > { %v1107_v36 = vadd.f32 %v1091_v46, %v1059_v55  ;;  %v1012_v60 = vadd.f32 %v996_v43, %v963_v38  ;;  %v916_v10 = vadd.f32 %v900_v50, %v868_v2  ;;  %v997_v52 = vmul.f32 %v1415_v51, %v1547_v20  ;;  %v1433_v2 = vld [vmem:[%s1530_s19 + $0x169] sm:$0xff] }
  0x82   : > { %v901_v15 = vmul.f32 %v1430_v8, %v1543_v18  ;;  %v820_v56 = vadd.f32 %v804_v47, %v772_v4  ;;  %v709_v1 = vmul.f32 %v1413_v16, %v1532_v11  ;;  %v757_v3 = vmul.f32 %v1429_v21, %v1534_v12 }
  0x83   : > { %v1123_v63 = vadd.f32 %v1636_v48, %v1107_v36  ;;  %v1060_v57 = vadd.f32 %v1044_v62, %v1012_v60  ;;  %v964_v9 = vadd.f32 %v948_v59, %v916_v10  ;;  %v1045_v5 = vmul.f32 %v1431_v0, %v1554_v26  ;;  %v1987_v62 = vld [vmem:[%s2069_s2] ss:$0 sm:$0xff] }
  0x84   : > { %v805_v28 = vmul.f32 %v1445_v41, %v1536_v13  ;;  %v869_v30 = vadd.f32 %v853_v61, %v820_v56  ;;  %v949_v6 = vmul.f32 %v1446_v37, %v1545_v19  ;;  %v773_v31 = vadd.f32 %v757_v3, %v709_v1  ;;  %v1418_v56 = vld [vmem:[%s1530_s19 + $0x170] sm:$0xff] }
  0x85   : > { %1461 = vst [vmem:[%s1647_s27 + $0xb0] sm:$0xff] %v1123_v63  ;;  %v854_v27 = vmul.f32 %v1415_v51, %v1538_v14  ;;  %v1108_v16 = vadd.f32 %v1092_v39, %v1060_v57  ;;  %v1013_v22 = vadd.f32 %v997_v52, %v964_v9  ;;  %v1093_v21 = vmul.f32 %v1937_v44, %v1447_v17  ;;  %v1449_v52 = vld [vmem:[%s1530_s19 + $0x16a] sm:$0xff] }
  0x86   : > { %v998_v35 = vmul.f32 %v1416_v58, %v1547_v20  ;;  %v917_v25 = vadd.f32 %v901_v15, %v869_v30  ;;  %v821_v24 = vadd.f32 %v805_v28, %v773_v31  ;;  %v902_v41 = vmul.f32 %v1431_v0, %v1543_v18 }
  0x87   : > { %v710_v33 = vmul.f32 %v1414_v42, %v1532_v11  ;;  %v1124_v29 = vadd.f32 %v1636_v48, %v1108_v16  ;;  %v1061_v45 = vadd.f32 %v1045_v5, %v1013_v22  ;;  %v758_v34 = vmul.f32 %v1430_v8, %v1534_v12 }
  0x88   : > { %v806_v32 = vmul.f32 %v1446_v37, %v1536_v13  ;;  %v965_v46 = vadd.f32 %v949_v6, %v917_v25  ;;  %v1046_v43 = vmul.f32 %v1432_v49, %v1554_v26  ;;  %v870_v53 = vadd.f32 %v854_v27, %v821_v24  ;;  %v1434_v27 = vld [vmem:[%s1530_s19 + $0x171] sm:$0xff] }
  0x89   : > { %v950_v50 = vmul.f32 %v1447_v17, %v1545_v19  ;;  %1462 = vst [vmem:[%s1647_s27 + $0xb8] sm:$0xff] %v1124_v29  ;;  %v1109_v54 = vadd.f32 %v1093_v21, %v1061_v45  ;;  %v1094_v42 = vmul.f32 %v1937_v44, %v1448_v40  ;;  %v774_v48 = vadd.f32 %v758_v34, %v710_v33  ;;  %v1450_v25 = vld [vmem:[%s1530_s19 + $0x172] sm:$0xff]  ;;  %v1419_v29 = vld [vmem:[%s1530_s19 + $0x180] sm:$0xff] }
  0x8a   : > { %v855_v55 = vmul.f32 %v1416_v58, %v1538_v14  ;;  %v1014_v8 = vadd.f32 %v998_v35, %v965_v46  ;;  %v918_v7 = vadd.f32 %v902_v41, %v870_v53  ;;  %v999_v47 = vmul.f32 %v1417_v23, %v1547_v20  ;;  %v1435_v53 = vld [vmem:[%s1530_s19 + $0x181] sm:$0xff] }
  0x8b   : > { %v903_v38 = vmul.f32 %v1432_v49, %v1543_v18  ;;  %v1125_v37 = vadd.f32 %v1987_v62, %v1109_v54  ;;  %v822_v59 = vadd.f32 %v806_v32, %v774_v48  ;;  %v711_v36 = vmul.f32 %v1415_v51, %v1532_v11 }
  0x8c   : > { %v759_v39 = vmul.f32 %v1431_v0, %v1534_v12  ;;  %v1062_v4 = vadd.f32 %v1046_v43, %v1014_v8  ;;  %v966_v61 = vadd.f32 %v950_v50, %v918_v7  ;;  %v1047_v60 = vmul.f32 %v1433_v2, %v1554_v26 }
  0x8d   : > { %v807_v10 = vmul.f32 %v1447_v17, %v1536_v13  ;;  %1463 = vst [vmem:[%s1647_s27 + $0xc0] sm:$0xff] %v1125_v37  ;;  %v871_v15 = vadd.f32 %v855_v55, %v822_v59  ;;  %v951_v63 = vmul.f32 %v1448_v40, %v1545_v19  ;;  %v856_v3 = vmul.f32 %v1417_v23, %v1538_v14  ;;  %v1420_v59 = vld [vmem:[%s1530_s19 + $0x188] sm:$0xff] }
  0x8e   : > { %v775_v1 = vadd.f32 %v759_v39, %v711_v36  ;;  %v1110_v51 = vadd.f32 %v1094_v42, %v1062_v4  ;;  %v1015_v57 = vadd.f32 %v999_v47, %v966_v61  ;;  %v1095_v0 = vmul.f32 %v1937_v44, %v1449_v52  ;;  %v1451_v47 = vld [vmem:[%s1530_s19 + $0x182] sm:$0xff] }
  0x8f   : > { %v1000_v9 = vmul.f32 %v1418_v56, %v1547_v20  ;;  %v919_v5 = vadd.f32 %v903_v38, %v871_v15  ;;  %v904_v17 = vmul.f32 %v1433_v2, %v1543_v18  ;;  %v712_v30 = vmul.f32 %v1416_v58, %v1532_v11 }
  0x90   : > { %v823_v28 = vadd.f32 %v807_v10, %v775_v1  ;;  %v1126_v6 = vadd.f32 %v1987_v62, %v1110_v51  ;;  %v1063_v31 = vadd.f32 %v1047_v60, %v1015_v57  ;;  %v760_v16 = vmul.f32 %v1432_v49, %v1534_v12  ;;  %v1421_v51 = vld [vmem:[%s1530_s19 + $0x198] sm:$0xff] }
  0x91   : > { %v808_v22 = vmul.f32 %v1448_v40, %v1536_v13  ;;  %v967_v21 = vadd.f32 %v951_v63, %v919_v5  ;;  %v1048_v35 = vmul.f32 %v1434_v27, %v1554_v26  ;;  %v952_v41 = vmul.f32 %v1449_v52, %v1545_v19 }
  0x92   : > { %v872_v24 = vadd.f32 %v856_v3, %v823_v28  ;;  %1464 = vst [vmem:[%s1647_s27 + $0xc8] sm:$0xff] %v1126_v6  ;;  %v1111_v33 = vadd.f32 %v1095_v0, %v1063_v31  ;;  %v1096_v58 = vmul.f32 %v1937_v44, %v1450_v25  ;;  %v776_v45 = vadd.f32 %v760_v16, %v712_v30  ;;  %v1436_v3 = vld [vmem:[%s1530_s19 + $0x189] sm:$0xff] }
  0x93   : > { %v857_v49 = vmul.f32 %v1418_v56, %v1538_v14  ;;  %v1016_v34 = vadd.f32 %v1000_v9, %v967_v21  ;;  %v1001_v46 = vmul.f32 %v1419_v29, %v1547_v20  ;;  %v905_v43 = vmul.f32 %v1434_v27, %v1543_v18  ;;  %v1453_v21 = vld [vmem:[%s1530_s19 + $0x19a] sm:$0xff] }
  0x94   : > { %v920_v32 = vadd.f32 %v904_v17, %v872_v24  ;;  %v1127_v40 = vadd.f32 %v1987_v62, %v1111_v33  ;;  %v824_v50 = vadd.f32 %v808_v22, %v776_v45  ;;  %v713_v54 = vmul.f32 %v1417_v23, %v1532_v11 }
  0x95   : > { %v761_v42 = vmul.f32 %v1433_v2, %v1534_v12  ;;  %v1064_v48 = vadd.f32 %v1048_v35, %v1016_v34  ;;  %v1049_v8 = vmul.f32 %v1435_v53, %v1554_v26  ;;  %v809_v7 = vmul.f32 %v1449_v52, %v1536_v13 }
  0x96   : > { %v968_v55 = vadd.f32 %v952_v41, %v920_v32  ;;  %1465 = vst [vmem:[%s1647_s27 + $0xd0] sm:$0xff] %v1127_v40  ;;  %v873_v38 = vadd.f32 %v857_v49, %v824_v50  ;;  %v953_v37 = vmul.f32 %v1450_v25, %v1545_v19  ;;  %v858_v39 = vmul.f32 %v1419_v29, %v1538_v14  ;;  %v1438_v32 = vld [vmem:[%s1530_s19 + $0x1a1] sm:$0xff] }
  0x97   : > { %v777_v36 = vadd.f32 %v761_v42, %v713_v54  ;;  %v1112_v23 = vadd.f32 %v1096_v58, %v1064_v48  ;;  %v1097_v2 = vmul.f32 %v1937_v44, %v1451_v47  ;;  %v1002_v61 = vmul.f32 %v1420_v59, %v1547_v20 }
  0x98   : > { %v1017_v4 = vadd.f32 %v1001_v46, %v968_v55  ;;  %v921_v60 = vadd.f32 %v905_v43, %v873_v38  ;;  %v906_v52 = vmul.f32 %v1435_v53, %v1543_v18  ;;  %v714_v15 = vmul.f32 %v1418_v56, %v1532_v11  ;;  %v1452_v11 = vld [vmem:[%s1530_s19 + $0x18a] sm:$0xff]  ;;  %v1437_v56 = vld [vmem:[%s1530_s19 + $0x199] sm:$0xff]  ;;  %v1454_v53 = vld [vmem:[%s1530_s19 + $0x1a2] sm:$0xff] }
  0x99   : > { %v825_v10 = vadd.f32 %v809_v7, %v777_v36  ;;  %v1128_v63 = vadd.f32 %v1987_v62, %v1112_v23  ;;  %v762_v57 = vmul.f32 %v1434_v27, %v1534_v12  ;;  %v810_v0 = vmul.f32 %v1450_v25, %v1536_v13 }
  0x9a   : > { %v1065_v1 = vadd.f32 %v1049_v8, %v1017_v4  ;;  %v969_v9 = vadd.f32 %v953_v37, %v921_v60  ;;  %v1050_v5 = vmul.f32 %v1436_v3, %v1554_v26  ;;  %v954_v17 = vmul.f32 %v1451_v47, %v1545_v19 }
  0x9b   : > { %v874_v28 = vadd.f32 %v858_v39, %v825_v10  ;;  %1466 = vst [vmem:[%s1647_s27 + $0xd8] sm:$0xff] %v1128_v63  ;;  %v778_v6 = vadd.f32 %v762_v57, %v714_v15  ;;  %v859_v31 = vmul.f32 %v1420_v59, %v1538_v14  ;;  %v1098_v12 = vmul.f32 %v1937_v44, %v1452_v11  ;;  %v1422_v14 = vld [vmem:[%s1530_s19 + $0x1a0] sm:$0xff] }
  0x9c   : > { %v1113_v30 = vadd.f32 %v1097_v2, %v1065_v1  ;;  %v1018_v16 = vadd.f32 %v1002_v61, %v969_v9  ;;  %v1003_v27 = vmul.f32 %v1421_v51, %v1547_v20  ;;  %v907_v25 = vmul.f32 %v1436_v3, %v1543_v18 }
  0x9d   : > { %v922_v13 = vadd.f32 %v906_v52, %v874_v28  ;;  %v826_v35 = vadd.f32 %v810_v0, %v778_v6  ;;  %v1051_v33 = vmul.f32 %v1437_v56, %v1554_v26  ;;  %v955_v29 = vmul.f32 %v1452_v11, %v1545_v19 }
  0x9e   : > { %v1129_v22 = vadd.f32 %v1987_v62, %v1113_v30  ;;  %v1066_v24 = vadd.f32 %v1050_v5, %v1018_v16  ;;  %v1099_v34 = vmul.f32 %v1937_v44, %v1453_v21  ;;  %v1004_v18 = vmul.f32 %v1422_v14, %v1547_v20 }
  0x9f   : > { %v970_v41 = vadd.f32 %v954_v17, %v922_v13  ;;  %v875_v58 = vadd.f32 %v859_v31, %v826_v35  ;;  %v1052_v54 = vmul.f32 %v1438_v32, %v1554_v26  ;;  %v1100_v48 = vmul.f32 %v1937_v44, %v1454_v53 }
  0xa0   : > { %1467 = vst [vmem:[%s1647_s27 + $0xe0] sm:$0xff] %v1129_v22  ;;  %v1114_v45 = vadd.f32 %v1098_v12, %v1066_v24 }
  0xa1   : > { %v1019_v49 = vadd.f32 %v1003_v27, %v970_v41  ;;  %v923_v46 = vadd.f32 %v907_v25, %v875_v58 }
  0xa2   : > { %v1130_v43 = vadd.f32 %v1987_v62, %v1114_v45 }
  0xa3   : > { %v1067_v40 = vadd.f32 %v1051_v33, %v1019_v49  ;;  %v971_v50 = vadd.f32 %v955_v29, %v923_v46 }
  0xa4   : > { %1468 = vst [vmem:[%s1647_s27 + $0xe8] sm:$0xff] %v1130_v43 }
  0xa5   : > { %v1115_v42 = vadd.f32 %v1099_v34, %v1067_v40  ;;  %v1020_v19 = vadd.f32 %v1004_v18, %v971_v50 }
  0xa7   : > { %v1131_v55 = vadd.f32 %v1987_v62, %v1115_v42  ;;  %v1068_v8 = vadd.f32 %v1052_v54, %v1020_v19 }
  0xa9   : > { %1469 = vst [vmem:[%s1647_s27 + $0xf0] sm:$0xff] %v1131_v55  ;;  %v1116_v7 = vadd.f32 %v1100_v48, %v1068_v8 }
  0xab   : > { %v1132_v47 = vadd.f32 %v1987_v62, %v1116_v7 }
  0xad   : > { %1470 = vst [vmem:[%s1647_s27 + $0xf8] sm:$0xff] %v1132_v47 }
  0xae PF: > { %s13_s12 = sadd.s32 1, %s1491_s12  }
  0xaf   : > { %p10_p4 = scmp.ge.s32.totalorder %s13_s12, 4  }
  0xb1   :  { %12 = sbr.rel (!%p10_p4) target bundleno = 1 (0x1), region = 68 }

</bundles_post_ra>
